<compile_context>
chip_gen: v7x
topology: tpu7x:2x2x1
jax: 0.10.0
libtpu: 0.0.40
codegen_flags: <defaults>
</compile_context>

<pallas_src>
import functools

import jax
import jax.numpy as jnp
from jax.experimental import pallas as pl
from jax.experimental.pallas import tpu as pltpu


def _round_up(a, m):
    return (a + m - 1) // m * m


def _vmem_limit_bytes():
    try:
        cap = pltpu.get_tpu_info().vmem_capacity_bytes
    except Exception:
        cap = 64 * 1024 * 1024  # conservative (v7x per-TC)
    return int(max(32 * 1024 * 1024, min(cap * 3 // 4, 100 * 1024 * 1024)))


def _resident_spec(shape, index_map):
    """BlockSpec for grid-constant blocks: single-buffered if supported."""
    try:
        return pl.BlockSpec(shape, index_map, pipeline_mode=pl.Buffered(1))
    except Exception:
        return pl.BlockSpec(shape, index_map)


def _pick_ft(filt_p):
    # Prefer FT >= 256 (fills the 256-wide v6e/v7x MXU); FT = filt_p when small.
    if filt_p <= 512:
        return filt_p
    for cand in (512, 384, 256):
        if filt_p % cand == 0:
            return cand
    return 128


def _ffn_kernel(xp_ref, w1_ref, b1_ref, w2_ref, b2_ref, o_ref, acc_ref,
                *, K, TQ, n_ft, act, use_im2col):
    # xp_ref: (1, slab_len, dim_p)    bf16 padded input slab for this batch element
    # w1_ref: (n_ft, K*dim_p, FT)     bf16 stacked conv weight, K**-0.5 folded in
    # b1_ref: (n_ft, 1, FT)           f32  conv bias, K**-0.5 folded in
    # w2_ref: (n_ft, FT, dim_p)       bf16 linear weight (transposed, filter-blocked)
    # b2_ref: (1, dim_p)              f32  linear bias
    # o_ref : (1, TQ, dim_p)          bf16 output tile
    # acc_ref: (TQ, dim_p)            f32  VMEM scratch accumulator
    dim_p = o_ref.shape[-1]
    s = pl.multiple_of(pl.program_id(1) * TQ, TQ)

    acc_ref[...] = jnp.zeros_like(acc_ref)

    if use_im2col:
        # im2col once per tile: output row j needs padded rows (s+j)..(s+j+K-1).
        xw = xp_ref[0, pl.ds(s, TQ + K - 1), :]                           # (TQ+K-1, dim_p)
        xs = jnp.concatenate([xw[k:k + TQ, :] for k in range(K)], axis=1)  # (TQ, K*dim_p)

    def ft_step(f):
        if use_im2col:
            h = jnp.dot(xs, w1_ref[f], preferred_element_type=jnp.float32)  # (TQ, FT)
        else:
            # K accumulated dots on shifted windows; contraction width = dim_p.
            h = jnp.dot(xp_ref[0, pl.ds(s, TQ), :],
                        w1_ref[f, pl.ds(0, dim_p), :],
                        preferred_element_type=jnp.float32)
            for k in range(1, K):
                h = h + jnp.dot(xp_ref[0, pl.ds(s + k, TQ), :],
                                w1_ref[f, pl.ds(k * dim_p, dim_p), :],
                                preferred_element_type=jnp.float32)
        h = h + b1_ref[f]                         # scale already folded into w1/b1
        if act == "relu":
            h = jnp.maximum(h, 0.0)
        else:
            h = jax.nn.gelu(h, approximate=True)  # tanh GELU -> EUP (no erf on TPU)
        # dropout: identity (inference)
        acc_ref[...] += jnp.dot(h.astype(w2_ref.dtype), w2_ref[f],
                                preferred_element_type=jnp.float32)

    if n_ft <= 4:
        for f in range(n_ft):          # small static unroll
            ft_step(f)
    else:
        @pl.loop(0, n_ft)              # keep live ranges bounded for many filter tiles
        def _(f):
            ft_step(f)

    o_ref[0] = (acc_ref[...] + b2_ref[...]).astype(o_ref.dtype)


def transform_ffn_layer(x, params, *, kernel_size, padding_type="same",
                        act_type="gelu", incremental_state=False,
                        time_tile=512):
    """x: (T, B, dim). Returns (T, B, dim), or (1, B, dim) if incremental."""
    assert act_type in ("relu", "gelu")
    T, B, dim = x.shape
    w1, b1, w2, b2 = params          # conv W (filter, dim, K), conv b (filter,),
                                     # linear W (dim, filter),  linear b (dim,)
    filter_size = w1.shape[0]
    K = kernel_size

    if padding_type == "same":
        pad_l = pad_r = K // 2
    else:  # 'left'
        pad_l, pad_r = K - 1, 0
    assert T + pad_l + pad_r - K + 1 == T, \
        "output length must equal input length (use odd K for 'same')"

    # ---- channel padding to lane-dense (multiples of 128); padded channels are zero.
    dim_p = _round_up(dim, 128)
    filt_p = _round_up(filter_size, 128)
    scale = float(K) ** (-0.5)

    FT = _pick_ft(filt_p)
    n_ft = filt_p // FT
    use_im2col = dim_p < 256   # narrow channels: widen the MXU contraction via im2col

    # conv weight (filter, dim, K) -> (K, dim_p, filt_p) -> (n_ft, K*dim_p, FT),
    # K**-0.5 folded in.
    w1_k = jnp.transpose(w1, (2, 1, 0)).astype(jnp.float32) * scale
    w1_k = jnp.pad(w1_k, ((0, 0), (0, dim_p - dim), (0, filt_p - filter_size)))
    w1_s = (w1_k.reshape(K * dim_p, n_ft, FT)
            .transpose(1, 0, 2).astype(jnp.bfloat16))                  # (n_ft, K*dim_p, FT)
    b1_r = jnp.pad(b1.astype(jnp.float32) * scale,
                   (0, filt_p - filter_size)).reshape(n_ft, 1, FT)
    # linear weight (dim, filter) -> (n_ft, FT, dim_p)
    w2_t = jnp.pad(jnp.transpose(w2, (1, 0)).astype(jnp.float32),
                   ((0, filt_p - filter_size), (0, dim_p - dim)))
    w2_t = w2_t.reshape(n_ft, FT, dim_p).astype(jnp.bfloat16)
    b2_r = jnp.pad(b2.astype(jnp.float32), (0, dim_p - dim)).reshape(1, dim_p)

    # ---- input: (T, B, dim) -> (B, Tp, dim_p) with conv zero padding on time.
    xb = jnp.transpose(x, (1, 0, 2))
    xb = jnp.pad(xb, ((0, 0), (pad_l, pad_r), (0, dim_p - dim)))
    tp_real = xb.shape[1]

    if incremental_state:
        # Only the last output step is needed; it depends only on the last K
        # padded rows.  Compute a single TQ=8 tile whose last row is step T-1.
        TQ = 8
        n_tq = 1
        win = TQ + K - 1
        take = min(tp_real, win)
        slab = xb[:, tp_real - take:, :]
        slab_len = _round_up(win, 8)
        slab = jnp.pad(slab, ((0, 0), (win - take, slab_len - win), (0, 0)))
    else:
        TQ = _round_up(min(int(time_tile), _round_up(T, 8)), 8)
        n_tq = (T + TQ - 1) // TQ
        t_pad_out = n_tq * TQ
        slab_len = _round_up(t_pad_out + K - 1, 8)
        slab = jnp.pad(xb, ((0, 0), (0, slab_len - tp_real), (0, 0)))

    slab = slab.astype(jnp.bfloat16)

    kernel = functools.partial(_ffn_kernel, K=K, TQ=TQ, n_ft=n_ft,
                               act=act_type, use_im2col=use_im2col)

    out_btd = pl.pallas_call(
        kernel,
        out_shape=jax.ShapeDtypeStruct((B, n_tq * TQ, dim_p), jnp.bfloat16),
        grid_spec=pltpu.PrefetchScalarGridSpec(
            num_scalar_prefetch=0,
            grid=(B, n_tq),
            in_specs=[
                # per-batch input slab: constant block index across the time-tile
                # axis -> stays resident in VMEM for the whole inner loop.
                pl.BlockSpec((1, slab_len, dim_p), lambda b, q: (b, 0, 0)),
                # grid-constant weights/biases: single-buffered.
                _resident_spec((n_ft, K * dim_p, FT), lambda b, q: (0, 0, 0)),
                _resident_spec((n_ft, 1, FT), lambda b, q: (0, 0, 0)),
                _resident_spec((n_ft, FT, dim_p), lambda b, q: (0, 0, 0)),
                _resident_spec((1, dim_p), lambda b, q: (0, 0)),
            ],
            out_specs=pl.BlockSpec((1, TQ, dim_p), lambda b, q: (b, q, 0)),
            scratch_shapes=[pltpu.VMEM((TQ, dim_p), jnp.float32)],
        ),
        compiler_params=pltpu.CompilerParams(
            dimension_semantics=("parallel", "parallel"),
            vmem_limit_bytes=_vmem_limit_bytes()),
    )(slab, w1_s, b1_r, w2_t, b2_r)

    if incremental_state:
        out = out_btd[:, TQ - 1:TQ, :dim]          # (B, 1, dim) -> last time step
    else:
        out = out_btd[:, :T, :dim]                 # (B, T, dim), drop tile padding
    # back to the module's (T|1, B, dim) layout; cast back to the caller's dtype.
    return jnp.transpose(out, (1, 0, 2)).astype(x.dtype)


def _reference(x, params, *, kernel_size, padding_type="same",
               act_type="gelu", incremental_state=False):
    """Plain-JAX f32 reference of the PyTorch forward (eval mode)."""
    w1, b1, w2, b2 = params
    K = kernel_size
    pad = (K // 2, K // 2) if padding_type == "same" else (K - 1, 0)
    xb = jnp.transpose(x, (1, 2, 0))          # (B, dim, T)  == NCT
    y = jax.lax.conv_general_dilated(
        xb, w1, window_strides=(1,), padding=[pad],
        dimension_numbers=("NCH", "OIH", "NCH"))
    y = y + b1[None, :, None]
    y = jnp.transpose(y, (2, 0, 1))           # (T, B, filter)
    y = y * float(K) ** (-0.5)
    if incremental_state:
        y = y[-1:]
    y = jnp.maximum(y, 0.0) if act_type == "relu" else jax.nn.gelu(y, approximate=False)
    return jnp.einsum("tbf,df->tbd", y, w2) + b2


def _rand_params(key, dim, filter_size, K, scale=0.05):
    k2, k3, k4, k5 = jax.random.split(key, 4)
    w1 = jax.random.normal(k2, (filter_size, dim, K), dtype=jnp.float32) * scale
    b1 = jax.random.normal(k3, (filter_size,), dtype=jnp.float32) * scale
    w2 = jax.random.normal(k4, (dim, filter_size), dtype=jnp.float32) * scale
    b2 = jax.random.normal(k5, (dim,), dtype=jnp.float32) * scale
    return (w1, b1, w2, b2)


if __name__ == "__main__":
    # bf16 MXU inputs + bf16 output + tanh-approx GELU vs the exact-erf f32
    # reference -> correspondingly loose tolerance.
    TOL = dict(atol=3e-2, rtol=3e-2)

    key = jax.random.PRNGKey(0)
    k_x, k_p = jax.random.split(key)

    # ---- config A: small dims (im2col path, FT = filt_p, static filter loop)
    B, dim, filter_size, K = 2, 32, 64, 3
    params = _rand_params(k_p, dim, filter_size, K)

    # 1) full sequence, single time tile
    T = 8
    x = jax.random.normal(k_x, (T, B, dim), dtype=jnp.float32)
    out = jax.block_until_ready(
        transform_ffn_layer(x, params, kernel_size=K, padding_type="same"))
    ref = _reference(x, params, kernel_size=K, padding_type="same")
    assert out.shape == (T, B, dim)
    assert jnp.allclose(out, ref, **TOL), "mismatch vs reference (full, 1 tile)"

    # 2) full sequence, multiple time tiles (exercises the (B, T//TQ) grid)
    T2 = 40
    x2 = jax.random.normal(jax.random.PRNGKey(7), (T2, B, dim), dtype=jnp.float32)
    out2 = jax.block_until_ready(
        transform_ffn_layer(x2, params, kernel_size=K, padding_type="same",
                            time_tile=16))
    ref2 = _reference(x2, params, kernel_size=K, padding_type="same")
    assert out2.shape == (T2, B, dim)
    assert jnp.allclose(out2, ref2, **TOL), "mismatch vs reference (multi-tile)"

    # 3) incremental decode: only the last step is computed
    out3 = jax.block_until_ready(
        transform_ffn_layer(x2, params, kernel_size=K, padding_type="same",
                            incremental_state=True))
    ref3 = _reference(x2, params, kernel_size=K, padding_type="same",
                      incremental_state=True)
    assert out3.shape == (1, B, dim)
    assert jnp.allclose(out3, ref3, **TOL), "mismatch vs reference (incremental)"

    # 4) wider channels (>=256): K-shifted-dots path, FT = filt_p = 384
    B4, dim4, filt4 = 1, 256, 384
    params4 = _rand_params(jax.random.PRNGKey(11), dim4, filt4, K, scale=0.03)
    x4 = jax.random.normal(jax.random.PRNGKey(12), (16, B4, dim4), dtype=jnp.float32)
    out4 = jax.block_until_ready(
        transform_ffn_layer(x4, params4, kernel_size=K, padding_type="same"))
    ref4 = _reference(x4, params4, kernel_size=K, padding_type="same")
    assert out4.shape == (16, B4, dim4)
    assert jnp.allclose(out4, ref4, **TOL), "mismatch vs reference (wide dim)"

    # 5) many filter tiles (n_ft > 4): pl.loop path, plus 'left' padding + relu
    filt5 = 640
    params5 = _rand_params(jax.random.PRNGKey(21), dim, filt5, K)
    x5 = jax.random.normal(jax.random.PRNGKey(22), (24, B, dim), dtype=jnp.float32)
    out5 = jax.block_until_ready(
        transform_ffn_layer(x5, params5, kernel_size=K, padding_type="left",
                            act_type="relu"))
    ref5 = _reference(x5, params5, kernel_size=K, padding_type="left",
                      act_type="relu")
    assert out5.shape == (24, B, dim)
    assert jnp.allclose(out5, ref5, **TOL), "mismatch vs reference (pl.loop / left / relu)"

    print("KERNEL_OK")
</pallas_src>

<mosaic_0001>
module attributes {stable_mosaic.version = 11 : i64} {
  func.func @_ffn_kernel(%arg0: i32, %arg1: i32, %arg2: memref<1x16x128xbf16, #tpu.memory_space<vmem>>, %arg3: memref<1x384x128xbf16, #tpu.memory_space<vmem>>, %arg4: memref<1x1x128xf32, #tpu.memory_space<vmem>>, %arg5: memref<1x128x128xbf16, #tpu.memory_space<vmem>>, %arg6: memref<1x128xf32, #tpu.memory_space<vmem>>, %arg7: memref<1x8x128xbf16, #tpu.memory_space<vmem>>, %arg8: memref<8x128xf32, #tpu.memory_space<vmem>>) attributes {dimension_semantics = [#tpu.dimension_semantics<parallel>, #tpu.dimension_semantics<parallel>], iteration_bounds = array<i64: 2, 1>, scalar_prefetch = 0 : i64, scratch_operands = 1 : i64, tpu.core_type = #tpu.core_type<tc>, window_params = [{transform_indices = @transform_0, window_bounds = array<i64: 1, 16, 128>}, {pipeline_mode = #tpu.pipeline_mode<synchronous>, transform_indices = @transform_1, window_bounds = array<i64: 1, 384, 128>}, {pipeline_mode = #tpu.pipeline_mode<synchronous>, transform_indices = @transform_2, window_bounds = array<i64: 1, 1, 128>}, {pipeline_mode = #tpu.pipeline_mode<synchronous>, transform_indices = @transform_3, window_bounds = array<i64: 1, 128, 128>}, {pipeline_mode = #tpu.pipeline_mode<synchronous>, transform_indices = @transform_4, window_bounds = array<i64: 1, 128>}, {transform_indices = @transform_5, window_bounds = array<i64: 1, 8, 128>}]} {
    %c8_i32 = arith.constant 8 : i32
    %0 = arith.muli %arg1, %c8_i32 : i32
    %1 = tpu.assume_multiple %0, 8 : i32
    %cst = arith.constant 0.000000e+00 : f32
    %2 = vector.broadcast %cst : f32 to vector<8x128xf32>
    %c0 = arith.constant 0 : index
    %c0_0 = arith.constant 0 : index
    %3 = vector.load %arg8[%c0, %c0_0] : memref<8x128xf32, #tpu.memory_space<vmem>>, vector<8x128xf32>
    tpu.vector_store %arg8[%c0, %c0_0], %2 {strides = array<i32>} : memref<8x128xf32, #tpu.memory_space<vmem>>, vector<8x128xf32>,
    %c0_1 = arith.constant 0 : index
    %4 = arith.index_cast %1 : i32 to index
    %c0_2 = arith.constant 0 : index
    %5 = vector.load %arg2[%c0_1, %4, %c0_2] : memref<1x16x128xbf16, #tpu.memory_space<vmem>>, vector<1x10x128xbf16>
    %6 = vector.shape_cast %5 : vector<1x10x128xbf16> to vector<10x128xbf16>
    %7 = vector.extract_strided_slice %6 {offsets = [0, 0], sizes = [8, 128], strides = [1, 1]} : vector<10x128xbf16> to vector<8x128xbf16>
    %8 = vector.extract_strided_slice %6 {offsets = [1, 0], sizes = [8, 128], strides = [1, 1]} : vector<10x128xbf16> to vector<8x128xbf16>
    %9 = vector.extract_strided_slice %6 {offsets = [2, 0], sizes = [8, 128], strides = [1, 1]} : vector<10x128xbf16> to vector<8x128xbf16>
    %10 = tpu.concatenate %7, %8, %9 in 1 : vector<8x128xbf16>, vector<8x128xbf16>, vector<8x128xbf16> -> vector<8x384xbf16>
    %c0_3 = arith.constant 0 : index
    %c0_4 = arith.constant 0 : index
    %c0_5 = arith.constant 0 : index
    %11 = vector.load %arg3[%c0_3, %c0_4, %c0_5] : memref<1x384x128xbf16, #tpu.memory_space<vmem>>, vector<1x384x128xbf16>
    %12 = vector.shape_cast %11 : vector<1x384x128xbf16> to vector<384x128xbf16>
    %cst_6 = arith.constant dense<0.000000e+00> : vector<8x128xf32>
    %13 = tpu.matmul %10, %12, %cst_6 {dimension_numbers = #tpu.dot_dimension_numbers<[1], [0], [0], [1], [0, 0, 1, 1], [], []>} : vector<8x384xbf16>, vector<384x128xbf16>, vector<8x128xf32> -> vector<8x128xf32>
    %c0_7 = arith.constant 0 : index
    %c0_8 = arith.constant 0 : index
    %c0_9 = arith.constant 0 : index
    %14 = vector.load %arg4[%c0_7, %c0_8, %c0_9] : memref<1x1x128xf32, #tpu.memory_space<vmem>>, vector<1x1x128xf32>
    %15 = vector.shape_cast %14 : vector<1x1x128xf32> to vector<1x128xf32>
    %16 = vector.broadcast %15 : vector<1x128xf32> to vector<8x128xf32>
    %17 = arith.addf %13, %16 : vector<8x128xf32>
    %18 = arith.mulf %17, %17 : vector<8x128xf32>
    %19 = arith.mulf %17, %18 : vector<8x128xf32>
    %cst_10 = arith.constant 4.471500e-02 : f32
    %20 = vector.broadcast %cst_10 : f32 to vector<8x128xf32>
    %21 = arith.mulf %20, %19 : vector<8x128xf32>
    %22 = arith.addf %17, %21 : vector<8x128xf32>
    %cst_11 = arith.constant 0.797884583 : f32
    %23 = vector.broadcast %cst_11 : f32 to vector<8x128xf32>
    %24 = arith.mulf %23, %22 : vector<8x128xf32>
    %25 = math.tanh %24 : vector<8x128xf32>
    %cst_12 = arith.constant 1.000000e+00 : f32
    %26 = vector.broadcast %cst_12 : f32 to vector<8x128xf32>
    %27 = arith.addf %26, %25 : vector<8x128xf32>
    %cst_13 = arith.constant 5.000000e-01 : f32
    %28 = vector.broadcast %cst_13 : f32 to vector<8x128xf32>
    %29 = arith.mulf %28, %27 : vector<8x128xf32>
    %30 = arith.mulf %17, %29 : vector<8x128xf32>
    %c0_14 = arith.constant 0 : index
    %c0_15 = arith.constant 0 : index
    %31 = vector.load %arg8[%c0_14, %c0_15] : memref<8x128xf32, #tpu.memory_space<vmem>>, vector<8x128xf32>
    %32 = arith.truncf %30 : vector<8x128xf32> to vector<8x128xbf16>
    %c0_16 = arith.constant 0 : index
    %c0_17 = arith.constant 0 : index
    %c0_18 = arith.constant 0 : index
    %33 = vector.load %arg5[%c0_16, %c0_17, %c0_18] : memref<1x128x128xbf16, #tpu.memory_space<vmem>>, vector<1x128x128xbf16>
    %34 = vector.shape_cast %33 : vector<1x128x128xbf16> to vector<128x128xbf16>
    %cst_19 = arith.constant dense<0.000000e+00> : vector<8x128xf32>
    %35 = tpu.matmul %32, %34, %cst_19 {dimension_numbers = #tpu.dot_dimension_numbers<[1], [0], [0], [1], [0, 0, 1, 1], [], []>} : vector<8x128xbf16>, vector<128x128xbf16>, vector<8x128xf32> -> vector<8x128xf32>
    %36 = arith.addf %31, %35 : vector<8x128xf32>
    %c0_20 = arith.constant 0 : index
    %c0_21 = arith.constant 0 : index
    %37 = vector.load %arg8[%c0_20, %c0_21] : memref<8x128xf32, #tpu.memory_space<vmem>>, vector<8x128xf32>
    tpu.vector_store %arg8[%c0_20, %c0_21], %36 {strides = array<i32>} : memref<8x128xf32, #tpu.memory_space<vmem>>, vector<8x128xf32>,
    %c0_22 = arith.constant 0 : index
    %c0_23 = arith.constant 0 : index
    %38 = vector.load %arg8[%c0_22, %c0_23] : memref<8x128xf32, #tpu.memory_space<vmem>>, vector<8x128xf32>
    %c0_24 = arith.constant 0 : index
    %c0_25 = arith.constant 0 : index
    %39 = vector.load %arg6[%c0_24, %c0_25] : memref<1x128xf32, #tpu.memory_space<vmem>>, vector<1x128xf32>
    %40 = vector.broadcast %39 : vector<1x128xf32> to vector<8x128xf32>
    %41 = arith.addf %38, %40 : vector<8x128xf32>
    %42 = arith.truncf %41 : vector<8x128xf32> to vector<8x128xbf16>
    %c0_26 = arith.constant 0 : index
    %c0_27 = arith.constant 0 : index
    %c0_28 = arith.constant 0 : index
    %43 = vector.load %arg7[%c0_26, %c0_27, %c0_28] : memref<1x8x128xbf16, #tpu.memory_space<vmem>>, vector<1x8x128xbf16>
    %44 = vector.shape_cast %43 : vector<1x8x128xbf16> to vector<8x128xbf16>
    %45 = vector.shape_cast %42 : vector<8x128xbf16> to vector<1x8x128xbf16>
    tpu.vector_store %arg7[%c0_26, %c0_27, %c0_28], %45 {strides = array<i32>} : memref<1x8x128xbf16, #tpu.memory_space<vmem>>, vector<1x8x128xbf16>,
    return
  }
  func.func @transform_0(%arg0: i32, %arg1: i32) -> (i32, i32, i32) {
    %c0_i32 = arith.constant 0 : i32
    %c0_i32_0 = arith.constant 0 : i32
    %c0_i32_1 = arith.constant 0 : i32
    return %arg0, %c0_i32, %c0_i32_0 : i32, i32, i32
  }
  func.func @transform_1(%arg0: i32, %arg1: i32) -> (i32, i32, i32) {
    %c0_i32 = arith.constant 0 : i32
    %c0_i32_0 = arith.constant 0 : i32
    %c0_i32_1 = arith.constant 0 : i32
    %c0_i32_2 = arith.constant 0 : i32
    return %c0_i32, %c0_i32_0, %c0_i32_1 : i32, i32, i32
  }
  func.func @transform_2(%arg0: i32, %arg1: i32) -> (i32, i32, i32) {
    %c0_i32 = arith.constant 0 : i32
    %c0_i32_0 = arith.constant 0 : i32
    %c0_i32_1 = arith.constant 0 : i32
    %c0_i32_2 = arith.constant 0 : i32
    return %c0_i32, %c0_i32_0, %c0_i32_1 : i32, i32, i32
  }
  func.func @transform_3(%arg0: i32, %arg1: i32) -> (i32, i32, i32) {
    %c0_i32 = arith.constant 0 : i32
    %c0_i32_0 = arith.constant 0 : i32
    %c0_i32_1 = arith.constant 0 : i32
    %c0_i32_2 = arith.constant 0 : i32
    return %c0_i32, %c0_i32_0, %c0_i32_1 : i32, i32, i32
  }
  func.func @transform_4(%arg0: i32, %arg1: i32) -> (i32, i32) {
    %c0_i32 = arith.constant 0 : i32
    %c0_i32_0 = arith.constant 0 : i32
    %c0_i32_1 = arith.constant 0 : i32
    return %c0_i32, %c0_i32_0 : i32, i32
  }
  func.func @transform_5(%arg0: i32, %arg1: i32) -> (i32, i32, i32) {
    %c0_i32 = arith.constant 0 : i32
    %c0_i32_0 = arith.constant 0 : i32
    return %arg0, %arg1, %c0_i32 : i32, i32, i32
  }
}

</mosaic_0001>

<bundles_post_ra>
// kernel: tpu_custom_call.1
= control target key start
LH: loop header
LB: loop body
LE: loop exit
PB: predicated region body
PF: predicated region fallthrough
CT: control target
= control target key end

     0   :  { %10 = vsyncpa [#allocation4], 0  ;;  %s1593_s0 = inlined_call_operand.hbm [shape: bf16[2,16,128], index: 0, kind: input, shape index: {}]   ;;  %s1594_s1 = inlined_call_operand.hbm [shape: bf16[1,384,128], index: 1, kind: input, shape index: {}]   ;;  %s1595_s2 = inlined_call_operand.vmem [shape: f32[1,1,128], index: 2, kind: input, shape index: {}]   ;;  %s1596_s3 = inlined_call_operand.hbm [shape: bf16[1,128,128], index: 3, kind: input, shape index: {}]   ;;  %s1597_s4 = inlined_call_operand.vmem [shape: f32[1,128], index: 4, kind: input, shape index: {}]   ;;  %s1598_s5 = inlined_call_operand.hbm [shape: bf16[2,8,128], index: 5, kind: output, shape index: {}]  }
   0x1   :  { %12 = vsyncpa [#allocation4 + $0x1], 0 }
   0x2   :  { %13 = vsyncpa [#allocation7], 0 }
   0x3   :  { %14 = vsyncpa [#allocation5], 0 }
   0x4   :  { %16 = vsyncpa [#allocation5 + $0x1], 0  ;;  %s1300_s18 = smov 0   ;;  %s1302_s19 = smov 0  }
   0x5   :  { %s1304_s20 = smov 0   ;;  %s1306_s21 = smov 0  }
   0x6   :  { %s1308_s22 = smov 0   ;;  %s1310_s23 = smov 0  }
   0x7 LB: > { %s832_s24 = sadd.s32 4294967295, %s1260_s23   ;;  %s833_s25 = sadd.s32 4294967294, %s1260_s23   ;;  %s1260_s23 = sphi %s1310_s23, %s22_s23   ;;  %s1256_s22 = sphi %s1308_s22, %s1622_s22   ;;  %s1252_s21 = sphi %s1306_s21, %s1621_s21   ;;  %s1248_s20 = sphi %s1304_s20, %s1620_s20   ;;  %s1244_s19 = sphi %s1302_s19, %s1619_s19   ;;  %s1240_s18 = sphi %s1300_s18, %s1618_s18  }
   0x8   : > { %p54_p0 = scmp.ne.s32.totalorder %s1244_s19, %s1240_s18  ;;  %p1334_p1 = scmp.eq.s32.totalorder %s832_s24, 0 }
   0x9   : > { %p1338_p2 = scmp.eq.s32.totalorder %s832_s24, 1  ;;  %p170_p3 = scmp.eq.s32.totalorder %s833_s25, 1 }
   0xa   : > { %s1604_s26 = scalar_select %p1334_p1, 1, 0 }
   0xb   : > { %p1344_p4 = por %p1334_p1, %p54_p0  ;;  %p834_p5 = scmp.ge.s32.totalorder %s1260_s23, 1 }
   0xc   : > { %p1349_p6 = por %p170_p3, %p54_p0  ;;  %p177_p7 = scmp.lt.s32.totalorder %s1260_s23, 3 }
   0xd   : > { %s1606_s28 = scalar_select %p1344_p4, 1, 0 }
   0xe   : > { %s1607_s29 = scalar_select %p1349_p6, 1, 0 }
   0xf   : > { %p1354_p8 = pnand %p834_p5, %p177_p7  ;;  %s1262_s6 = smov [#allocation6]  }
  0x10   : > { %s189_s7 = sshll.u32 %s1262_s6, 4  ;;  %s1263_s9 = smov [#allocation8]   ;;  %s1358_s7 = int_to_ptr.vmem [resolvable:$true] %s189_s7 }
  0x11   : > { %p978_p9 = pneg %p1354_p8  ;;  %s205_s10 = sshll.u32 %s1263_s9, 4  ;;  %s1369_s10 = int_to_ptr.vmem [resolvable:$true] %s205_s10 }
  0x12   : > { %s1088_s13 = scalar_lea.hbm %s1594_s1, 3072 }
  0x13   : > { %p1365_p11 = pnand %p978_p9, %p1334_p1  ;;  %p1089_p12 = scmp.ne.s32.totalorder %s1594_s1, %s1088_s13 }
  0x14   : > { %p1095_p5 = scmp.lt.u32.totalorder %s1088_s13, %s1594_s1 }
  0x15   : > { %p1090_p13 = pneg %p1365_p11 }
  0x17   : > { %p1091_p0 = pnand %p1090_p13, %p1089_p12 }
  0x19   : > { %p1092_p3 = pneg %p1091_p0 }
  0x1b   : > { %p1097_p7 = pnand %p1095_p5, %p1092_p3 }
  0x1d   : > { %1100 = shalt.err (!%p1097_p7)
}
  0x1e   : > { %s1101_s24 = scalar_lea.vmem %s1358_s7, 3072  ;;  %p1109_p1 = scmp.lt.s32.totalorder %s1358_s7, %s1358_s7 }
  0x1f   : > { %p1102_p9 = scmp.ne.s32.totalorder %s1358_s7, %s1101_s24  ;;  %p1110_p12 = scmp.lt.s32.totalorder %s1101_s24, %s1101_s24 }
  0x21   : > { %p1104_p10 = pnand %p1102_p9, %p1090_p13  ;;  %p1111_p0 = por %p1110_p12, %p1109_p1 }
  0x23   : > { %p1105_p6 = pneg %p1104_p10 }
  0x25   : > { %p1112_p4 = pnand %p1111_p0, %p1105_p6 }
  0x27   : > { %1115 = shalt.err (!%p1112_p4)
}
  0x28   : > { %s1602_s25 = smov 64   ;;  %s1265_s6 = smov 4  }
  0x29   : > { %981 = dma.hbm_to_vmem [thread:$0]  (!%p1365_p11), %s1594_s1, 3072, %s1358_s7, [#allocation7], %s1602_s25, %s1602_s25, %s1265_s6  }
  0x2a   : > { %s1116_s14 = scalar_lea.hbm %s1596_s3, 1024 }
  0x2b   : > { %p1117_p1 = scmp.ne.s32.totalorder %s1596_s3, %s1116_s14  ;;  %p1123_p10 = scmp.lt.u32.totalorder %s1116_s14, %s1596_s3 }
  0x2d   : > { %p1119_p4 = pnand %p1117_p1, %p1090_p13 }
  0x2f   : > { %p1120_p6 = pneg %p1119_p4 }
  0x31   : > { %p1125_p3 = pnand %p1123_p10, %p1120_p6 }
  0x33   : > { %1128 = shalt.err (!%p1125_p3)
}
  0x34   : > { %s1129_s7 = scalar_lea.vmem %s1369_s10, 1024  ;;  %p1137_p12 = scmp.lt.s32.totalorder %s1369_s10, %s1369_s10 }
  0x35   : > { %p1130_p5 = scmp.ne.s32.totalorder %s1369_s10, %s1129_s7  ;;  %p1138_p0 = scmp.lt.s32.totalorder %s1129_s7, %s1129_s7 }
  0x37   : > { %p1132_p7 = pnand %p1130_p5, %p1090_p13  ;;  %p1139_p1 = por %p1138_p0, %p1137_p12 }
  0x39   : > { %p1133_p9 = pneg %p1132_p7 }
  0x3b   : > { %p1140_p4 = pnand %p1139_p1, %p1133_p9 }
  0x3d   : > { %1143 = shalt.err (!%p1140_p4)
}
  0x3e   : > { %984 = dma.hbm_to_vmem [thread:$0]  (!%p1365_p11), %s1596_s3, 1024, %s1369_s10, [#allocation7], %s1602_s25, %s1602_s25, %s1265_s6  }
  0x3f   : > { %s34_s8 = sadd.s32 1, %s1256_s22  ;;  %s41_s12 = sadd.s32 1, %s1248_s20 }
  0x40   : > { %p36_p13 = scmp.ge.s32.totalorder %s34_s8, 2  ;;  %p48_p6 = scmp.ne.s32.totalorder %s1248_s20, %s1244_s19 }
  0x41   : > { %p49_p10 = scmp.eq.s32.totalorder %s1260_s23, 0  ;;  %p995_p3 = scmp.lt.s32.totalorder %s1260_s23, 2 }
  0x42   : > { %s1624_s8 = smov (%p36_p13, %s34_s8), 0  ;;  %p1439_p7 = por %p1338_p2, %p48_p6 }
  0x43   : > { %p50_p5 = por %p49_p10, %p48_p6  ;;  %s38_s14 = ssub.s32 %s1256_s22, %s1624_s8 }
  0x44   : > { %s1610_s13 = scalar_select %p1439_p7, 1, 0 }
  0x45   : > { %s222_s15 = sand.u32 1, %s1248_s20   ;;  %p39_p9 = scmp.eq.s32.totalorder %s38_s14, 0 }
  0x46   : > { %s838_s10 = sshll.u32 %s222_s15, 3  ;;  %s885_s16 = sshll.u32 %s1256_s22, 7 }
  0x47   : > { %s1448_s17 = scalar_select %p39_p9, %s1248_s20, %s41_s12  }
  0x48   : > { %s1453_s9 = scalar_lea.hbm %s1593_s0, %s885_s16  ;;  %s226_s27 = scalar_lea.vmem [#allocation3], %s838_s10 }
  0x49   : > { %s233_s11 = sshll.u32 %s226_s27, 4  ;;  %p1457_p2 = pnand %p995_p3, %p50_p5  ;;  %s1461_s11 = int_to_ptr.vmem [resolvable:$true] %s233_s11 }
  0x4a   : > { %s1463_s12 = scalar_lea.sflag [#allocation4], %s222_s15  ;;  %s1144_s14 = scalar_lea.hbm %s1453_s9, 128 }
  0x4b   : > { %p1145_p11 = scmp.ne.s32.totalorder %s1453_s9, %s1144_s14  ;;  %p1146_p12 = pneg %p1457_p2 }
  0x4c   : > { %s1149_s24 = scalar_lea.hbm %s1593_s0, 256  ;;  %p1150_p4 = scmp.lt.u32.totalorder %s1453_s9, %s1593_s0 }
  0x4d   : > { %p1147_p0 = pnand %p1146_p12, %p1145_p11  ;;  %p1151_p13 = scmp.lt.u32.totalorder %s1149_s24, %s1144_s14 }
  0x4e   : > { %p1153_p10 = scmp.lt.u32.totalorder %s1144_s14, %s1453_s9 }
  0x4f   : > { %p1148_p1 = pneg %p1147_p0  ;;  %p1152_p6 = por %p1151_p13, %p1150_p4 }
  0x51   : > { %p1154_p3 = por %p1153_p10, %p1152_p6 }
  0x53   : > { %p1155_p5 = pnand %p1154_p3, %p1148_p1 }
  0x55   : > { %1158 = shalt.err (!%p1155_p5)
}
  0x56   : > { %s1159_s15 = scalar_lea.vmem %s1461_s11, 128  ;;  %s1266_s10 = smov [#allocation3]  }
  0x57   : > { %p1160_p9 = scmp.ne.s32.totalorder %s1461_s11, %s1159_s15  ;;  %s1164_s16 = sshll.u32 %s1266_s10, 4  ;;  %s1165_s16 = int_to_ptr.vmem [resolvable:$false] %s1164_s16 }
  0x58   : > { %s1166_s7 = scalar_lea.vmem %s1165_s16, 256  ;;  %p1167_p7 = scmp.lt.s32.totalorder %s1461_s11, %s1165_s16 }
  0x59   : > { %p1162_p11 = pnand %p1160_p9, %p1146_p12  ;;  %p1168_p4 = scmp.lt.s32.totalorder %s1166_s7, %s1159_s15 }
  0x5b   : > { %p1163_p0 = pneg %p1162_p11  ;;  %p1169_p13 = por %p1168_p4, %p1167_p7 }
  0x5d   : > { %p1170_p6 = pnand %p1169_p13, %p1163_p0 }
  0x5f   : > { %1173 = shalt.err (!%p1170_p6)
}
  0x60   : > { %s1612_s14 = smov 64   ;;  %245 = sbr.rel (%p1354_p8) target bundleno = 619 (0x26b), region = 40 }
  0x61   : > { %988 = dma.hbm_to_vmem [thread:$0]  (!%p1457_p2), %s1453_s9, 128, %s1461_s11, %s1463_s12, %s1612_s14, %s1612_s14, %s1265_s6  }
  0x62   : > { %s1497_s24 = sand.u32 (!%p1354_p8), 1, %s1244_s19   ;;  %p1613_p7 = scmp.ne.s32.totalorder (!%p1354_p8), %s1606_s28, 0 }
  0x63   : > { %s842_s27 = sshll.u32 (!%p1354_p8), %s1497_s24, 3  ;;  %s248_s15 = scalar_lea.sflag (!%p1354_p8), [#allocation4], %s1497_s24 }
  0x64   : > { %s1501_s10 = scalar_lea.vmem (!%p1354_p8), [#allocation3], %s842_s27 }
  0x67   : > { %1227 = dma.done.wait (%p1613_p7), %s248_s15, 128  }
  0x68   : > { %1229 = vsyncadd (%p1613_p7), %s248_s15, 4294967168  ;;  %p1614_p2 = scmp.ne.s32.totalorder %s1604_s26, 0 }
  0x6a   : > { %1231 = dma.done.wait (%p1614_p2), [#allocation7], 4096  }
  0x6b   : > { %1233 = vsyncadd (%p1614_p2), [#allocation7], 4294963200  ;;  %v1267_v0 = vmov 0.0   ;;  %vm1268_vm0 = vmmov 0   ;;  %v1053_v1 = vld [vmem:[#allocation6 + $0x40] sm:$0xff]   ;;  %v1056_v4 = vld [vmem:[#allocation6 + $0x48] sm:$0xff]  }
  0x6c   : > { %926 = vmatprep.subr.bf16.mxu1 %v1267_v0  ;;  %942 = vmatprep.mubr.msk.bf16.mxu1 %vm1268_vm0, %v1267_v0  ;;  %v1054_v2 = vld [vmem:[#allocation6] sm:$0xff]   ;;  %v1057_v5 = vld [vmem:[#allocation6 + $0x8] sm:$0xff]   ;;  %v1059_v7 = vld [vmem:[#allocation6 + $0x50] sm:$0xff]   ;;  %s845_s30 = sshll.u32 %s1497_s24, 2  ;;  %s882_s9 = sshll.u32 %s1252_s21, 6 }
  0x6d   : > { %886 = vmatprep.subr.bf16.mxu0 %v1053_v1  ;;  %v1055_v3 = vld [vmem:[#allocation6 + $0x80] sm:$0xff]   ;;  %v1058_v6 = vld [vmem:[#allocation6 + $0x88] sm:$0xff]   ;;  %v1060_v8 = vld [vmem:[#allocation6 + $0x10] sm:$0xff]   ;;  %s285_s11 = scalar_lea.vmem [#allocation9], %s845_s30  ;;  %s1544_s14 = scalar_lea.hbm %s1598_s5, %s882_s9 }
  0x6e   : > { %887 = vmatpush3.bf16.msra.mxu0 %v1054_v2  ;;  %927 = vmatpush3.bf16.msra.mxu1 %v1055_v3  ;;  %v1061_v9 = vld [vmem:[#allocation6 + $0x90] sm:$0xff]   ;;  %v1062_v10 = vld [vmem:[#allocation6 + $0x58] sm:$0xff]   ;;  %v1065_v13 = vld [vmem:[#allocation6 + $0x60] sm:$0xff]   ;;  %s732_s12 = sshll.u32 %s285_s11, 4  ;;  %s718_s27 = scalar_lea.sflag [#allocation5], %s1497_s24  ;;  %s1546_s12 = int_to_ptr.vmem [resolvable:$true] %s732_s12 }
  0x6f   : > { %888 = vmatprep.subr.bf16.mxu0 %v1056_v4  ;;  %928 = vmatprep.subr.bf16.mxu1 %v1267_v0  ;;  %v1063_v11 = vld [vmem:[#allocation6 + $0x18] sm:$0xff]   ;;  %v1066_v14 = vld [vmem:[#allocation6 + $0x20] sm:$0xff]   ;;  %v1068_v16 = vld [vmem:[#allocation6 + $0x68] sm:$0xff]   ;;  %s1174_s21 = scalar_lea.vmem %s1546_s12, 64  ;;  %p1615_p12 = scmp.ne.s32.totalorder %s1610_s13, 0 }
  0x70   : > { %v1064_v12 = vld [vmem:[#allocation6 + $0x98] sm:$0xff]   ;;  %v1067_v15 = vld [vmem:[#allocation6 + $0xa0] sm:$0xff]   ;;  %v1069_v17 = vld [vmem:[#allocation6 + $0x28] sm:$0xff]   ;;  %p1175_p8 = scmp.ne.s32.totalorder %s1546_s12, %s1174_s21  ;;  %s1269_s15 = smov [#allocation9]  }
  0x71   : > { %v1070_v18 = vld [vmem:[#allocation6 + $0xa8] sm:$0xff]   ;;  %v1071_v19 = vld [vmem:[#allocation6 + $0x70] sm:$0xff]   ;;  %v1074_v24 = vld [vmem:[#allocation6 + $0x78] sm:$0xff]  }
  0x72   : > { %889 = vmatpush3.bf16.msra.mxu0 %v1057_v5  ;;  %929 = vmatpush3.bf16.msra.mxu1 %v1058_v6  ;;  %v1072_v20 = vld [vmem:[#allocation6 + $0x30] sm:$0xff]   ;;  %v1075_v26 = vld [vmem:[#allocation6 + $0x38] sm:$0xff]   ;;  %v1078_v33 = vld [vmem:[#allocation8] sm:$0xff]   ;;  %p1176_p1 = pnand %p1175_p8, %p1615_p12 }
  0x73   : > { %890 = vmatprep.subr.bf16.mxu0 %v1059_v7  ;;  %930 = vmatprep.subr.bf16.mxu1 %v1267_v0  ;;  %v1073_v21 = vld [vmem:[#allocation6 + $0xb0] sm:$0xff]   ;;  %v1077_v30 = vld [vmem:[#allocation6 + $0xb8] sm:$0xff]   ;;  %v1079_v34 = vld [vmem:[#allocation8 + $0x8] sm:$0xff]  }
  0x74   : > { %v293_v22 = vld [vmem:[%s1501_s10] sm:$0xf]  ;;  %v294_v23 = vld [vmem:[%s1501_s10 + $0x4] sm:$0x1]  ;;  %v1082_v37 = vld [vmem:[#allocation8 + $0x20] sm:$0xff]   ;;  %p1177_p10 = pneg %p1176_p1  ;;  %s1178_s10 = sshll.u32 %s1269_s15, 4  ;;  %s1179_s10 = int_to_ptr.vmem [resolvable:$false] %s1178_s10 }
  0x75   : > { %v846_v25 = vcombine.low %v293_v22, %v294_v23  ;;  %v1080_v35 = vld [vmem:[#allocation8 + $0x10] sm:$0xff]   ;;  %v1081_v36 = vld [vmem:[#allocation8 + $0x18] sm:$0xff]   ;;  %v1083_v38 = vld [vmem:[#allocation8 + $0x28] sm:$0xff]   ;;  %s1180_s26 = scalar_lea.vmem %s1179_s10, 128  ;;  %p1181_p3 = scmp.lt.s32.totalorder %s1546_s12, %s1179_s10 }
  0x76   : > { %891 = vmatpush3.bf16.msra.mxu0 %v1060_v8  ;;  %931 = vmatpush3.bf16.msra.mxu1 %v1061_v9  ;;  %v1084_v39 = vld [vmem:[#allocation8 + $0x30] sm:$0xff]   ;;  %v1085_v40 = vld [vmem:[#allocation8 + $0x38] sm:$0xff]   ;;  %p1182_p5 = scmp.lt.s32.totalorder %s1180_s26, %s1174_s21 }
  0x77   : > { %892 = vmatprep.subr.bf16.mxu0 %v1062_v10  ;;  %932 = vmatprep.subr.bf16.mxu1 %v1267_v0  ;;  %v301_v27 = vshrl.u32 %v846_v25, 16  ;;  %v303_v28 = vshll.u32 %v846_v25, 16  ;;  %v308_v32 = vrot.slane %v846_v25, 1  ;;  %v847_v43 = vld [vmem:[%s1595_s2] ss:$0 sm:$0xff] }
  0x78   : > { %v880_v63 = vld [vmem:[%s1597_s4] ss:$0 sm:$0xff]  ;;  %p1183_p9 = por %p1182_p5, %p1181_p3 }
  0x79   : > { %v305_v29 = vrot.slane %v303_v28, 1 }
  0x7a   : > { %893 = vmatpush3.bf16.msra.mxu0 %v1063_v11  ;;  %933 = vmatpush3.bf16.msra.mxu1 %v1064_v12  ;;  %p1184_p11 = pnand %p1183_p9, %p1177_p10 }
  0x7b   : > { %894 = vmatprep.subr.bf16.mxu0 %v1065_v13  ;;  %934 = vmatprep.subr.bf16.mxu1 %v1267_v0  ;;  %v306_v31 = vor.u32 %v305_v29, %v301_v27 }
  0x7d   : > { %541 = vmatprep.mubr.bf16.mxu0 %v306_v31 }
  0x7e   : > { %895 = vmatpush3.bf16.msra.mxu0 %v1066_v14  ;;  %935 = vmatpush3.bf16.msra.mxu1 %v1067_v15 }
  0x7f   : > { %896 = vmatprep.subr.bf16.mxu0 %v1068_v16  ;;  %936 = vmatprep.subr.bf16.mxu1 %v1267_v0 }
  0x82   : > { %897 = vmatpush3.bf16.msra.mxu0 %v1069_v17  ;;  %937 = vmatpush3.bf16.msra.mxu1 %v1070_v18 }
  0x83   : > { %898 = vmatprep.subr.bf16.mxu0 %v1071_v19  ;;  %938 = vmatprep.subr.bf16.mxu1 %v1267_v0 }
  0x86   : > { %899 = vmatpush3.bf16.msra.mxu0 %v1072_v20  ;;  %939 = vmatpush3.bf16.msra.mxu1 %v1073_v21 }
  0x87   : > { %900 = vmatprep.subr.bf16.mxu0 %v1074_v24  ;;  %940 = vmatprep.subr.bf16.mxu1 %v1267_v0 }
  0x8a   : > { %901 = vmatpush3.bf16.msra.mxu0 %v1075_v26  ;;  %941 = vmatpush3.bf16.msra.mxu1 %v1077_v30 }
  0x8b   : > { %946 = vmatprep.subr.bf16.mxu0 %v1267_v0 }
  0x8d   : > { %542 = vmatmul.mubr.bf16.vlgmr.msra.gmra.mrb[0].mxu0 %v293_v22  ;;  %943 = vmatmul.mubr.bf16.vlgmr.msra.gmra.mrb[0].mxu1 %v308_v32 }
  0x8e   : > { %962 = vmatprep.mubr.msk.bf16.mxu0 %vm1268_vm0, %v1267_v0  ;;  %947 = vmatpush3.bf16.msra.mxu0 %v1078_v33 }
  0x8f   : > { %948 = vmatprep.subr.bf16.mxu0 %v1267_v0 }
  0x92   : > { %949 = vmatpush3.bf16.msra.mxu0 %v1079_v34 }
  0x93   : > { %950 = vmatprep.subr.bf16.mxu0 %v1267_v0 }
  0x96   : > { %951 = vmatpush3.bf16.msra.mxu0 %v1080_v35 }
  0x97   : > { %952 = vmatprep.subr.bf16.mxu0 %v1267_v0 }
  0x9a   : > { %953 = vmatpush3.bf16.msra.mxu0 %v1081_v36 }
  0x9b   : > { %954 = vmatprep.subr.bf16.mxu0 %v1267_v0 }
  0x9e   : > { %955 = vmatpush3.bf16.msra.mxu0 %v1082_v37 }
  0x9f   : > { %956 = vmatprep.subr.bf16.mxu0 %v1267_v0 }
  0xa2   : > { %957 = vmatpush3.bf16.msra.mxu0 %v1083_v38 }
  0xa3   : > { %958 = vmatprep.subr.bf16.mxu0 %v1267_v0 }
  0xa6   : > { %959 = vmatpush3.bf16.msra.mxu0 %v1084_v39 }
  0xa7   : > { %960 = vmatprep.subr.bf16.mxu0 %v1267_v0 }
  0xaa   : > { %961 = vmatpush3.bf16.msra.mxu0 %v1085_v40 }
 0x160   : > { %v902_v41 = vpop.f32.mrb[0].mxu0  ;;  %v583_v44 = vpop.f32.mrb[0].mxu1 }
 0x161   : > { %v903_v42 = vpop.f32.mrb[1].mxu0  ;;  %v944_v47 = vpop.f32.mrb[1].mxu1 }
 0x162   : > { %v904_v45 = vadd.f32 %v903_v42, %v902_v41  ;;  %v905_v46 = vpop.f32.mrb[2].mxu0  ;;  %v586_v49 = vpop.f32.mrb[2].mxu1 }
 0x163   : > { %v906_v48 = vpop.f32.mrb[3].mxu0  ;;  %v945_v51 = vpop.f32.mrb[3].mxu1 }
 0x164   : > { %v544_v50 = vadd.f32 %v904_v45, %v847_v43 }
 0x166   : > { %v584_v52 = vadd.f32 %v583_v44, %v544_v50 }
 0x168   : > { %v589_v53 = vmul.f32 %v584_v52, %v584_v52 }
 0x16a   : > { %v590_v54 = vmul.f32 %v589_v53, %v584_v52 }
 0x16c   : > { %v591_v55 = vmul.f32 0.044715, %v590_v54 }
 0x16e   : > { %v592_v56 = vadd.f32 %v591_v55, %v584_v52 }
 0x170   : > { %v593_v57 = vmul.f32 0.7978846, %v592_v56 }
 0x172   : > { %1086 = vtanh.f32 %v593_v57 }
 0x17c   : > { %v1087_v58 = vpop.eup %1086 }
 0x17d   : > { %v595_v59 = vadd.f32 1.0, %v1087_v58 }
 0x17f   : > { %v596_v60 = vmul.f32 0.5, %v595_v59 }
 0x181   : > { %v597_v61 = vmul.f32 %v596_v60, %v584_v52 }
 0x183   : > { %v599_v62 = vpack.c.bf16 %v597_v61, %v597_v61 }
 0x185   : > { %963 = vmatmul.mubr.bf16.vlgmr.msra.gmra.mrb[4].mxu0 %v599_v62 }
 0x258   : > { %v698_v0 = vpop.f32.mrb[4].mxu0 }
 0x259   : > { %v714_v1 = vadd.f32 %v880_v63, %v698_v0  ;;  %v964_v2 = vpop.f32.mrb[5].mxu0 }
 0x25a   : > { %v701_v3 = vpop.f32.mrb[6].mxu0 }
 0x25b   : > { %v715_v4 = vpack.c.bf16 %v714_v1, %v714_v1  ;;  %v965_v5 = vpop.f32.mrb[7].mxu0 }
 0x25d   : > { %716 = vst [vmem:[%s285_s11] sm:$0xf] %v715_v4 }
 0x25e   : > { %1187 = shalt.err (!%p1184_p11)
}
 0x25f   : > { %s1188_s24 = scalar_lea.hbm %s1544_s14, 64  ;;  %s1192_s25 = scalar_lea.hbm %s1598_s5, 128 }
 0x260   : > { %p1189_p0 = scmp.ne.s32.totalorder %s1544_s14, %s1188_s24  ;;  %p1193_p6 = scmp.lt.u32.totalorder %s1544_s14, %s1598_s5 }
 0x261   : > { %p1194_p7 = scmp.lt.u32.totalorder %s1192_s25, %s1188_s24  ;;  %p1196_p8 = scmp.lt.u32.totalorder %s1188_s24, %s1544_s14 }
 0x262   : > { %p1190_p4 = pnand %p1189_p0, %p1615_p12 }
 0x263   : > { %p1195_p2 = por %p1194_p7, %p1193_p6 }
 0x264   : > { %p1191_p13 = pneg %p1190_p4 }
 0x265   : > { %p1197_p1 = por %p1196_p8, %p1195_p2 }
 0x267   : > { %p1198_p10 = pnand %p1197_p1, %p1191_p13 }
 0x269   : > { %1201 = shalt.err (!%p1198_p10)
}
 0x26a   : > { %976 = dma.vmem_to_hbm [thread:$0]  (%p1615_p12), %s1546_s12, 64, %s1544_s14, %s718_s27  }
 0x26b PF: > { %s744_s11 = sand.u32 1, %s1240_s18   ;;  %p1616_p3 = scmp.ne.s32.totalorder %s1607_s29, 0 }
 0x26c   : > { %p1617_p5 = scmp.ge.s32.totalorder %s1260_s23, 2  ;;  %s745_s16 = scalar_lea.sflag [#allocation5], %s744_s11 }
 0x26e   : > { %p990_p9 = pnand %p1617_p5, %p1616_p3 }
 0x270   : > { %1235 = dma.done.wait (!%p990_p9), %s745_s16, 64  }
 0x271   : > { %1237 = vsyncadd (!%p990_p9), %s745_s16, 4294967232  ;;  %s22_s23 = sadd.s32 1, %s1260_s23   ;;  %s1618_s18 = smov %s1244_s19 }
 0x272   : > { %p19_p11 = scmp.ge.s32.totalorder %s22_s23, 4   ;;  %s1619_s19 = smov %s1248_s20 }
 0x273   : > { %s1620_s20 = smov %s1448_s17  ;;  %s1621_s21 = smov %s1256_s22 }
 0x274   : > { %s1622_s22 = smov %s1624_s8  ;;  %21 = sbr.rel (!%p19_p11) target bundleno = 7 (0x7), region = 94 }
 0x27b   :  { %750 = vsyncpa [#allocation4], 1 }
 0x27c   :  { %752 = vsyncpa [#allocation4 + $0x1], 1 }
 0x27d   :  { %753 = vsyncpa [#allocation7], 1 }
 0x27e   :  { %754 = vsyncpa [#allocation5], 1 }
 0x27f   :  { %756 = vsyncpa [#allocation5 + $0x1], 1 }

</bundles_post_ra>
